<compile_context>
chip_gen: v6e
topology: v6e:2x2x1
jax: 0.10.0
libtpu: 0.0.40
codegen_flags: <defaults>
</compile_context>

<pallas_src>
import functools

import jax
import jax.numpy as jnp
from jax import lax
from jax.experimental import pallas as pl
from jax.experimental.pallas import tpu as pltpu


DEFAULT_TILE_N = 64 * 1024      # 2 MiB f32 input block per grid step
MAX_TILE_N = 256 * 1024         # keeps double-buffered VMEM under ~48 MiB (v7x safe)


def _round_up(x, m):
    return ((x + m - 1) // m) * m


def _image_plane_kernel(packed_ref, *out_refs, dim, n_rays, tile_n,
                        emit_rays_image):
    if emit_rays_image:
        img_ref, tv_ref, tt_ref, ii_ref = out_refs
    else:
        tv_ref, tt_ref, ii_ref = out_refs

    i = pl.program_id(0)

    x = packed_ref[...].astype(jnp.float32)          # (3*dim-1, TN)
    px = x[0:1, :]                                   # P_x
    p_t = x[1:dim, :]                                # transverse P   (dim-1, TN)
    vx = x[dim:dim + 1, :]                           # V_x
    v_t = x[dim + 1:2 * dim, :]                      # transverse V   (dim-1, TN)
    obj = x[2 * dim:, :]                             # rays_object    (dim-1, TN)

    # CircularPlane collision with the plane x == 0  ->  t = -P_x / V_x
    t = -px / vx                                     # (1, TN)
    rays_image = p_t + t * v_t                       # (dim-1, TN)

    if emit_rays_image:
        img_ref[...] = rays_image.astype(img_ref.dtype)

    def write_sums(o, im):
        # Per-block f32 partial sums; each stored as a (1, 1, 1) block.
        tv_ref[...] = jnp.sum(o * im, keepdims=True).reshape(1, 1, 1)
        tt_ref[...] = jnp.sum(o * o, keepdims=True).reshape(1, 1, 1)
        ii_ref[...] = jnp.sum(im * im, keepdims=True).reshape(1, 1, 1)

    if n_rays % tile_n == 0:
        # All tiles are full: masking skipped statically.
        write_sums(obj, rays_image)
    else:
        last = pl.num_programs(0) - 1

        @pl.when(i != last)
        def _full_tile():
            write_sums(obj, rays_image)

        @pl.when(i == last)
        def _partial_tile():
            # Mask lanes beyond the true ray count.  Padded input lanes are
            # uninitialized and may be NaN/Inf; keep the select (jnp.where),
            # do NOT replace it with a multiply-by-mask.
            col = i * tile_n + lax.broadcasted_iota(jnp.int32, (1, tile_n), 1)
            valid = col < n_rays
            write_sums(jnp.where(valid, obj, 0.0),
                       jnp.where(valid, rays_image, 0.0))


def image_plane_forward_packed(packed, dim, *, magnification=None,
                               tile_n=DEFAULT_TILE_N, with_rays_image=True):
    """ImagePlane.forward hot path on component-major packed rays.

    packed: (3*dim-1, N) rows [P_0..P_{d-1}, V_0..V_{d-1}, T_1..T_{d-1}]
            (T = rays_object transverse coordinates).
    Returns (rays_image (dim-1, N) component-major or None, loss f32 scalar).
    """
    rows, n = packed.shape
    assert rows == 3 * dim - 1, (rows, dim)

    if n == 0:
        # ImagePlane.forward returns `data` unchanged when there are no rays.
        img = jnp.zeros((dim - 1, 0), packed.dtype) if with_rays_image else None
        return img, jnp.zeros((), jnp.float32)

    # Lane-aligned tile over the ray axis, clamped to the array extent and to
    # the VMEM budget.
    tn = _round_up(min(tile_n, _round_up(n, 128), MAX_TILE_N), 128)
    n_blocks = pl.cdiv(n, tn)

    # VMEM budget: double-buffered input block + (dim-1, TN) output block that
    # pads to 8 sublanes.  Cap the scoped limit at 48 MiB so it is safe on
    # v7x's 64 MiB physical VMEM as well as v5e/v6e's 128 MiB.
    rows_pad = _round_up(rows, 8)
    in_block_bytes = rows_pad * tn * 4
    img_block_bytes = 8 * tn * 4 if with_rays_image else 0
    vmem_need = 2 * (in_block_bytes + img_block_bytes) + (2 << 20)
    vmem_limit = int(min(max(vmem_need, 32 << 20), 48 << 20))

    kernel = functools.partial(
        _image_plane_kernel,
        dim=dim, n_rays=n, tile_n=tn, emit_rays_image=with_rays_image)

    sums_shape = jax.ShapeDtypeStruct((n_blocks, 1, 1), jnp.float32)
    sums_spec = pl.BlockSpec((1, 1, 1), lambda i: (i, 0, 0))

    out_shape = [sums_shape, sums_shape, sums_shape]
    out_specs = [sums_spec, sums_spec, sums_spec]
    if with_rays_image:
        out_shape = [jax.ShapeDtypeStruct((dim - 1, n), packed.dtype)] + out_shape
        out_specs = [pl.BlockSpec((dim - 1, tn), lambda i: (0, i))] + out_specs

    outs = pl.pallas_call(
        kernel,
        out_shape=tuple(out_shape),
        grid=(n_blocks,),
        in_specs=[pl.BlockSpec((rows, tn), lambda i: (0, i))],
        out_specs=tuple(out_specs),
        compiler_params=pltpu.CompilerParams(
            # Every block is independent (per-block partial sums, no carried
            # accumulator) -> both v7x TensorCores get half the blocks.
            dimension_semantics=("parallel",),
            vmem_limit_bytes=vmem_limit),
    )(packed)

    if with_rays_image:
        rays_image_cm, tv_p, tt_p, ii_p = outs
    else:
        tv_p, tt_p, ii_p = outs
        rays_image_cm = None

    # Tiny epilogue in plain JAX: pairwise-reduce the per-block partials and
    # form mag / loss.  sum(res**2) == s_ii - 2*mag*s_tv + mag**2*s_tt; clamp
    # at 0 since the exact value is a sum of squares (the closed form can go
    # slightly negative from cancellation when the fit is nearly perfect).
    s_tv = jnp.sum(tv_p)
    s_tt = jnp.sum(tt_p)
    s_ii = jnp.sum(ii_p)
    mag = s_tv / s_tt
    sq_res = jnp.maximum(s_ii - 2.0 * mag * s_tv + mag * mag * s_tt, 0.0)
    if magnification is None:
        loss = sq_res
    else:
        loss = (jnp.asarray(magnification, jnp.float32) - mag) ** 2 + sq_res
    return rays_image_cm, loss.astype(jnp.float32)


def image_plane_forward(P, V, rays_object, *, magnification=None,
                        tile_n=DEFAULT_TILE_N):
    """Row-major (N, D) convenience wrapper (PyTorch convention).

    NOTE: the concatenate + transposes below are extra HBM passes (~2-3x the
    kernel's own traffic).  Performance-sensitive callers should keep rays
    component-major end-to-end and use image_plane_forward_packed directly.
    """
    N, D = P.shape
    if N == 0:
        return jnp.zeros((0, D - 1), P.dtype), jnp.zeros((), jnp.float32)
    packed = jnp.concatenate([P, V, rays_object], axis=1).T     # (3D-1, N)
    img_cm, loss = image_plane_forward_packed(
        packed, D, magnification=magnification, tile_n=tile_n)
    return img_cm.T, loss


if __name__ == "__main__":
    key = jax.random.PRNGKey(0)
    k1, k2, k3, k4, k5 = jax.random.split(key, 5)

    # 2000 rays in 3D, built component-major (no pack/transpose in the hot path).
    N, D = 2000, 3
    target_mag = 2.0          # ImagePlane(diameter=10.0, magnification=2.0)

    # Ray origins behind the image plane (x < 0); directions with a positive x
    # component so every ray hits the plane x == 0.
    px = -1.0 - jax.random.uniform(k1, (1, N), jnp.float32)
    p_t = 0.2 * jax.random.normal(k2, (D - 1, N), jnp.float32)
    v_raw = jnp.concatenate(
        [0.5 + jax.random.uniform(k3, (1, N), jnp.float32),
         0.3 * jax.random.normal(k4, (D - 1, N), jnp.float32)], axis=0)
    v = v_raw / jnp.linalg.norm(v_raw, axis=0, keepdims=True)
    obj = 0.5 * jax.random.normal(k5, (D - 1, N), jnp.float32)
    packed = jnp.concatenate([px, p_t, v, obj], axis=0)          # (8, N)

    # Pure-JAX reference (same math as the PyTorch module).
    P_ref, V_ref, T_ref = packed[:D], packed[D:2 * D], packed[2 * D:]
    t_ref = -P_ref[0] / V_ref[0]
    img_ref = (P_ref + t_ref[None, :] * V_ref)[1:]               # (2, N)
    mag_ref = jnp.sum(T_ref * img_ref) / jnp.sum(T_ref ** 2)
    res_ref = img_ref - mag_ref * T_ref
    sq_ref = jnp.sum(res_ref ** 2)
    loss_ref = (target_mag - mag_ref) ** 2 + sq_ref

    # 1) Production config (big tile -> single block at this small N).
    img1, loss1 = image_plane_forward_packed(packed, D, magnification=target_mag)
    # 2) Small tile: 4 blocks, partial last tile (exercises the parallel grid
    #    and the masked last-block path).
    img2, loss2 = image_plane_forward_packed(
        packed, D, magnification=target_mag, tile_n=512)
    # 3) Loss-only variant (no rays_image output), no target magnification.
    _, loss3 = image_plane_forward_packed(
        packed, D, magnification=None, tile_n=512, with_rays_image=False)
    # 4) Exactly divisible N: static skip of the masking path.
    packed_1024 = packed[:, :1024]
    img4, loss4 = image_plane_forward_packed(
        packed_1024, D, magnification=target_mag, tile_n=512)
    jax.block_until_ready((img1, loss1, img2, loss2, loss3, img4, loss4))

    assert img1.shape == (D - 1, N) and loss1.shape == ()
    assert jnp.allclose(img1, img_ref, rtol=1e-5, atol=1e-5)
    assert jnp.allclose(img2, img_ref, rtol=1e-5, atol=1e-5)
    assert jnp.allclose(loss1, loss_ref, rtol=1e-4, atol=1e-4)
    assert jnp.allclose(loss2, loss_ref, rtol=1e-4, atol=1e-4)
    assert jnp.allclose(loss3, sq_ref, rtol=1e-4, atol=1e-4)

    T1024, I1024 = T_ref[:, :1024], img_ref[:, :1024]
    mag1024 = jnp.sum(T1024 * I1024) / jnp.sum(T1024 ** 2)
    loss1024 = (target_mag - mag1024) ** 2 + jnp.sum((I1024 - mag1024 * T1024) ** 2)
    assert jnp.allclose(img4, img_ref[:, :1024], rtol=1e-5, atol=1e-5)
    assert jnp.allclose(loss4, loss1024, rtol=1e-4, atol=1e-4)

    # Row-major convenience wrapper (PyTorch (N, D) convention) still matches.
    img_rm, loss_rm = image_plane_forward(
        P_ref.T, V_ref.T, T_ref.T, magnification=target_mag)
    jax.block_until_ready((img_rm, loss_rm))
    assert jnp.allclose(img_rm, img_ref.T, rtol=1e-5, atol=1e-5)
    assert jnp.allclose(loss_rm, loss_ref, rtol=1e-4, atol=1e-4)

    print("KERNEL_OK")
</pallas_src>

<mosaic_0001>
module attributes {stable_mosaic.version = 11 : i64} {
  func.func @_image_plane_kernel(%arg0: i32, %arg1: memref<8x2048xf32, #tpu.memory_space<vmem>>, %arg2: memref<2x2048xf32, #tpu.memory_space<vmem>>, %arg3: memref<1x1x1xf32, #tpu.memory_space<vmem>>, %arg4: memref<1x1x1xf32, #tpu.memory_space<vmem>>, %arg5: memref<1x1x1xf32, #tpu.memory_space<vmem>>) attributes {dimension_semantics = [#tpu.dimension_semantics<parallel>], iteration_bounds = array<i64: 1>, scalar_prefetch = 0 : i64, scratch_operands = 0 : i64, tpu.core_type = #tpu.core_type<tc>, window_params = [{transform_indices = @transform_0, window_bounds = array<i64: 8, 2048>}, {transform_indices = @transform_1, window_bounds = array<i64: 2, 2048>}, {transform_indices = @transform_2, window_bounds = array<i64: 1, 1, 1>}, {transform_indices = @transform_3, window_bounds = array<i64: 1, 1, 1>}, {transform_indices = @transform_4, window_bounds = array<i64: 1, 1, 1>}]} {
    %c0 = arith.constant 0 : index
    %c0_0 = arith.constant 0 : index
    %0 = vector.load %arg1[%c0, %c0_0] : memref<8x2048xf32, #tpu.memory_space<vmem>>, vector<8x2048xf32>
    %1 = vector.extract_strided_slice %0 {offsets = [0, 0], sizes = [1, 2048], strides = [1, 1]} : vector<8x2048xf32> to vector<1x2048xf32>
    %2 = vector.extract_strided_slice %0 {offsets = [1, 0], sizes = [2, 2048], strides = [1, 1]} : vector<8x2048xf32> to vector<2x2048xf32>
    %3 = vector.extract_strided_slice %0 {offsets = [3, 0], sizes = [1, 2048], strides = [1, 1]} : vector<8x2048xf32> to vector<1x2048xf32>
    %4 = vector.extract_strided_slice %0 {offsets = [4, 0], sizes = [2, 2048], strides = [1, 1]} : vector<8x2048xf32> to vector<2x2048xf32>
    %5 = vector.extract_strided_slice %0 {offsets = [6, 0], sizes = [2, 2048], strides = [1, 1]} : vector<8x2048xf32> to vector<2x2048xf32>
    %cst = arith.constant 0.000000e+00 : f32
    %6 = vector.broadcast %cst : f32 to vector<1x2048xf32>
    %7 = arith.subf %6, %1 : vector<1x2048xf32>
    %8 = arith.divf %7, %3 : vector<1x2048xf32>
    %9 = vector.broadcast %8 : vector<1x2048xf32> to vector<2x2048xf32>
    %10 = arith.mulf %9, %4 : vector<2x2048xf32>
    %11 = arith.addf %2, %10 : vector<2x2048xf32>
    %c0_1 = arith.constant 0 : index
    %c0_2 = arith.constant 0 : index
    %12 = vector.load %arg2[%c0_1, %c0_2] : memref<2x2048xf32, #tpu.memory_space<vmem>>, vector<2x2048xf32>
    tpu.vector_store %arg2[%c0_1, %c0_2], %11 {strides = array<i32>} : memref<2x2048xf32, #tpu.memory_space<vmem>>, vector<2x2048xf32>,
    %c0_i32 = arith.constant 0 : i32
    %13 = arith.cmpi ne, %arg0, %c0_i32 : i32
    %14 = arith.extui %13 : i1 to i32
    %c0_i32_3 = arith.constant 0 : i32
    %15 = arith.cmpi ne, %14, %c0_i32_3 : i32
    scf.if %15 {
      %19 = arith.mulf %5, %11 : vector<2x2048xf32>
      %20 = vector.shape_cast %19 : vector<2x2048xf32> to vector<1x2x2048xf32>
      %cst_6 = arith.constant dense<0.000000e+00> : vector<1xf32>
      %21 = vector.multi_reduction <add>, %20, %cst_6 [1, 2] : vector<1x2x2048xf32> to vector<1xf32>
      %22 = vector.shape_cast %21 : vector<1xf32> to vector<1x1x1xf32>
      %23 = vector.extract %22[0, 0, 0] : f32 from vector<1x1x1xf32>
      %24 = vector.broadcast %23 : f32 to vector<1x1xf32>
      %25 = vector.shape_cast %24 : vector<1x1xf32> to vector<1x1x1xf32>
      %c0_7 = arith.constant 0 : index
      %c0_8 = arith.constant 0 : index
      %c0_9 = arith.constant 0 : index
      %26 = vector.load %arg3[%c0_7, %c0_8, %c0_9] : memref<1x1x1xf32, #tpu.memory_space<vmem>>, vector<1x1x1xf32>
      tpu.vector_store %arg3[%c0_7, %c0_8, %c0_9], %25 {strides = array<i32>} : memref<1x1x1xf32, #tpu.memory_space<vmem>>, vector<1x1x1xf32>,
      %27 = arith.mulf %5, %5 : vector<2x2048xf32>
      %28 = vector.shape_cast %27 : vector<2x2048xf32> to vector<1x2x2048xf32>
      %cst_10 = arith.constant dense<0.000000e+00> : vector<1xf32>
      %29 = vector.multi_reduction <add>, %28, %cst_10 [1, 2] : vector<1x2x2048xf32> to vector<1xf32>
      %30 = vector.shape_cast %29 : vector<1xf32> to vector<1x1x1xf32>
      %31 = vector.extract %30[0, 0, 0] : f32 from vector<1x1x1xf32>
      %32 = vector.broadcast %31 : f32 to vector<1x1xf32>
      %33 = vector.shape_cast %32 : vector<1x1xf32> to vector<1x1x1xf32>
      %c0_11 = arith.constant 0 : index
      %c0_12 = arith.constant 0 : index
      %c0_13 = arith.constant 0 : index
      %34 = vector.load %arg4[%c0_11, %c0_12, %c0_13] : memref<1x1x1xf32, #tpu.memory_space<vmem>>, vector<1x1x1xf32>
      tpu.vector_store %arg4[%c0_11, %c0_12, %c0_13], %33 {strides = array<i32>} : memref<1x1x1xf32, #tpu.memory_space<vmem>>, vector<1x1x1xf32>,
      %35 = arith.mulf %11, %11 : vector<2x2048xf32>
      %36 = vector.shape_cast %35 : vector<2x2048xf32> to vector<1x2x2048xf32>
      %cst_14 = arith.constant dense<0.000000e+00> : vector<1xf32>
      %37 = vector.multi_reduction <add>, %36, %cst_14 [1, 2] : vector<1x2x2048xf32> to vector<1xf32>
      %38 = vector.shape_cast %37 : vector<1xf32> to vector<1x1x1xf32>
      %39 = vector.extract %38[0, 0, 0] : f32 from vector<1x1x1xf32>
      %40 = vector.broadcast %39 : f32 to vector<1x1xf32>
      %41 = vector.shape_cast %40 : vector<1x1xf32> to vector<1x1x1xf32>
      %c0_15 = arith.constant 0 : index
      %c0_16 = arith.constant 0 : index
      %c0_17 = arith.constant 0 : index
      %42 = vector.load %arg5[%c0_15, %c0_16, %c0_17] : memref<1x1x1xf32, #tpu.memory_space<vmem>>, vector<1x1x1xf32>
      tpu.vector_store %arg5[%c0_15, %c0_16, %c0_17], %41 {strides = array<i32>} : memref<1x1x1xf32, #tpu.memory_space<vmem>>, vector<1x1x1xf32>,
    } else {
    }
    %c0_i32_4 = arith.constant 0 : i32
    %16 = arith.cmpi eq, %arg0, %c0_i32_4 : i32
    %17 = arith.extui %16 : i1 to i32
    %c0_i32_5 = arith.constant 0 : i32
    %18 = arith.cmpi ne, %17, %c0_i32_5 : i32
    scf.if %18 {
      %c2048_i32 = arith.constant 2048 : i32
      %19 = arith.muli %arg0, %c2048_i32 : i32
      %20 = tpu.iota {dimensions = array<i32: 1>} : vector<1x2048xi32>
      %21 = vector.broadcast %19 : i32 to vector<1x2048xi32>
      %22 = arith.addi %21, %20 : vector<1x2048xi32>
      %c2000_i32 = arith.constant 2000 : i32
      %23 = vector.broadcast %c2000_i32 : i32 to vector<1x2048xi32>
      %24 = arith.cmpi slt, %22, %23 : vector<1x2048xi32>
      %cst_6 = arith.constant 0.000000e+00 : f32
      %25 = vector.shape_cast %24 : vector<1x2048xi1> to vector<1x2048xi1>
      %26 = vector.broadcast %25 : vector<1x2048xi1> to vector<2x2048xi1>
      %27 = vector.broadcast %cst_6 : f32 to vector<2x2048xf32>
      %28 = arith.select %26, %5, %27 : vector<2x2048xi1>, vector<2x2048xf32>
      %cst_7 = arith.constant 0.000000e+00 : f32
      %29 = vector.shape_cast %24 : vector<1x2048xi1> to vector<1x2048xi1>
      %30 = vector.broadcast %29 : vector<1x2048xi1> to vector<2x2048xi1>
      %31 = vector.broadcast %cst_7 : f32 to vector<2x2048xf32>
      %32 = arith.select %30, %11, %31 : vector<2x2048xi1>, vector<2x2048xf32>
      %33 = arith.mulf %28, %32 : vector<2x2048xf32>
      %34 = vector.shape_cast %33 : vector<2x2048xf32> to vector<1x2x2048xf32>
      %cst_8 = arith.constant dense<0.000000e+00> : vector<1xf32>
      %35 = vector.multi_reduction <add>, %34, %cst_8 [1, 2] : vector<1x2x2048xf32> to vector<1xf32>
      %36 = vector.shape_cast %35 : vector<1xf32> to vector<1x1x1xf32>
      %37 = vector.extract %36[0, 0, 0] : f32 from vector<1x1x1xf32>
      %38 = vector.broadcast %37 : f32 to vector<1x1xf32>
      %39 = vector.shape_cast %38 : vector<1x1xf32> to vector<1x1x1xf32>
      %c0_9 = arith.constant 0 : index
      %c0_10 = arith.constant 0 : index
      %c0_11 = arith.constant 0 : index
      %40 = vector.load %arg3[%c0_9, %c0_10, %c0_11] : memref<1x1x1xf32, #tpu.memory_space<vmem>>, vector<1x1x1xf32>
      tpu.vector_store %arg3[%c0_9, %c0_10, %c0_11], %39 {strides = array<i32>} : memref<1x1x1xf32, #tpu.memory_space<vmem>>, vector<1x1x1xf32>,
      %41 = arith.mulf %28, %28 : vector<2x2048xf32>
      %42 = vector.shape_cast %41 : vector<2x2048xf32> to vector<1x2x2048xf32>
      %cst_12 = arith.constant dense<0.000000e+00> : vector<1xf32>
      %43 = vector.multi_reduction <add>, %42, %cst_12 [1, 2] : vector<1x2x2048xf32> to vector<1xf32>
      %44 = vector.shape_cast %43 : vector<1xf32> to vector<1x1x1xf32>
      %45 = vector.extract %44[0, 0, 0] : f32 from vector<1x1x1xf32>
      %46 = vector.broadcast %45 : f32 to vector<1x1xf32>
      %47 = vector.shape_cast %46 : vector<1x1xf32> to vector<1x1x1xf32>
      %c0_13 = arith.constant 0 : index
      %c0_14 = arith.constant 0 : index
      %c0_15 = arith.constant 0 : index
      %48 = vector.load %arg4[%c0_13, %c0_14, %c0_15] : memref<1x1x1xf32, #tpu.memory_space<vmem>>, vector<1x1x1xf32>
      tpu.vector_store %arg4[%c0_13, %c0_14, %c0_15], %47 {strides = array<i32>} : memref<1x1x1xf32, #tpu.memory_space<vmem>>, vector<1x1x1xf32>,
      %49 = arith.mulf %32, %32 : vector<2x2048xf32>
      %50 = vector.shape_cast %49 : vector<2x2048xf32> to vector<1x2x2048xf32>
      %cst_16 = arith.constant dense<0.000000e+00> : vector<1xf32>
      %51 = vector.multi_reduction <add>, %50, %cst_16 [1, 2] : vector<1x2x2048xf32> to vector<1xf32>
      %52 = vector.shape_cast %51 : vector<1xf32> to vector<1x1x1xf32>
      %53 = vector.extract %52[0, 0, 0] : f32 from vector<1x1x1xf32>
      %54 = vector.broadcast %53 : f32 to vector<1x1xf32>
      %55 = vector.shape_cast %54 : vector<1x1xf32> to vector<1x1x1xf32>
      %c0_17 = arith.constant 0 : index
      %c0_18 = arith.constant 0 : index
      %c0_19 = arith.constant 0 : index
      %56 = vector.load %arg5[%c0_17, %c0_18, %c0_19] : memref<1x1x1xf32, #tpu.memory_space<vmem>>, vector<1x1x1xf32>
      tpu.vector_store %arg5[%c0_17, %c0_18, %c0_19], %55 {strides = array<i32>} : memref<1x1x1xf32, #tpu.memory_space<vmem>>, vector<1x1x1xf32>,
    } else {
    }
    return
  }
  func.func @transform_0(%arg0: i32) -> (i32, i32) {
    %c0_i32 = arith.constant 0 : i32
    %c0_i32_0 = arith.constant 0 : i32
    return %c0_i32, %arg0 : i32, i32
  }
  func.func @transform_1(%arg0: i32) -> (i32, i32) {
    %c0_i32 = arith.constant 0 : i32
    %c0_i32_0 = arith.constant 0 : i32
    return %c0_i32, %arg0 : i32, i32
  }
  func.func @transform_2(%arg0: i32) -> (i32, i32, i32) {
    %c0_i32 = arith.constant 0 : i32
    %c0_i32_0 = arith.constant 0 : i32
    %c0_i32_1 = arith.constant 0 : i32
    return %arg0, %c0_i32, %c0_i32_0 : i32, i32, i32
  }
  func.func @transform_3(%arg0: i32) -> (i32, i32, i32) {
    %c0_i32 = arith.constant 0 : i32
    %c0_i32_0 = arith.constant 0 : i32
    %c0_i32_1 = arith.constant 0 : i32
    return %arg0, %c0_i32, %c0_i32_0 : i32, i32, i32
  }
  func.func @transform_4(%arg0: i32) -> (i32, i32, i32) {
    %c0_i32 = arith.constant 0 : i32
    %c0_i32_0 = arith.constant 0 : i32
    %c0_i32_1 = arith.constant 0 : i32
    return %arg0, %c0_i32, %c0_i32_0 : i32, i32, i32
  }
}

</mosaic_0001>

<bundles_post_ra>
// kernel: tpu_custom_call.1
= control target key start
LH: loop header
LB: loop body
LE: loop exit
PB: predicated region body
PF: predicated region fallthrough
CT: control target
= control target key end

     0   :  { %10 = vsyncpa [#allocation3], 0  ;;  %s1934_s0 = inlined_call_operand.hbm [shape: f32[8,2000], index: 0, kind: input, shape index: {}]   ;;  %s1935_s1 = inlined_call_operand.hbm [shape: f32[2,2000], index: 1, kind: output, shape index: {0}]   ;;  %s1936_s2 = inlined_call_operand.hbm [shape: f32[1,1,1], index: 2, kind: output, shape index: {1}]   ;;  %s1937_s3 = inlined_call_operand.hbm [shape: f32[1,1,1], index: 3, kind: output, shape index: {2}]   ;;  %s1938_s4 = inlined_call_operand.hbm [shape: f32[1,1,1], index: 4, kind: output, shape index: {3}]  }
   0x1   :  { %11 = vsyncpa [#allocation4], 0 }
   0x2   :  { %12 = vsyncpa [#allocation7], 0 }
   0x3   :  { %13 = vsyncpa [#allocation10], 0  ;;  %s1457_s15 = smov [#allocation2]  }
   0x4   :  { %s20_s16 = sshll.u32 %s1457_s15, 4  ;;  %s21_s16 = int_to_ptr.vmem [resolvable:$true] %s20_s16 }
   0x5   :  { %s1357_s17 = scalar_lea.vmem %s21_s16, 2048  ;;  %p1362_p1 = scmp.lt.s32.totalorder %s21_s16, %s21_s16 }
   0x6   :  { %p1358_p0 = scmp.ne.s32.totalorder %s21_s16, %s1357_s17  ;;  %p1363_p2 = scmp.lt.s32.totalorder %s1357_s17, %s1357_s17 }
   0x8   :  { %p1364_p3 = por %p1363_p2, %p1362_p1 }
   0xa   :  { %p1365_p4 = pnand %p1364_p3, %p1358_p0 }
   0xc   :  { %1368 = shalt.err (!%p1365_p4)
}
   0xd   :  { %23 = dma.hbm_to_vmem [thread:$0]  %s1934_s0, 2048, %s21_s16, [#allocation3]  }
   0xe   :  { %1449 = dma.done.wait [#allocation3], 2048  }
   0xf   :  { %1450 = vsyncadd [#allocation3], 4294965248  ;;  %v1491_v0 = vld [vmem:[#allocation2] sm:$0xff]  ;;  %v1493_v1 = vld [vmem:[#allocation2 + $0x8] sm:$0xff]  ;;  %v139_v6 = vlaneseq  ;;  %v1458_v9 = vmov 1983009808  }
  0x10   :  { %v1495_v2 = vld [vmem:[#allocation2 + $0x10] sm:$0xff]  ;;  %v1497_v3 = vld [vmem:[#allocation2 + $0x18] sm:$0xff]  ;;  %v75_v4 = vrot.slane %v1491_v0, 3  ;;  %v76_v5 = vrot.slane %v1493_v1, 3  ;;  %v1501_v7 = vld [vmem:[#allocation2 + $0x20] sm:$0xff]  ;;  %v302_v10 = vunpack.c.l.s4 %v1458_v9  ;;  %v43_v27 = vsub.f32 0.0, %v1491_v0 }
  0x11   :  { %v77_v8 = vrot.slane %v1495_v2, 3  ;;  %v78_v11 = vrot.slane %v1497_v3, 3  ;;  %v1505_v12 = vld [vmem:[#allocation2 + $0x28] sm:$0xff]  ;;  %v1507_v13 = vld [vmem:[#allocation2 + $0x30] sm:$0xff]  ;;  %v79_v14 = vrot.slane %v1501_v7, 3  ;;  %v140_v15 = vshrl.u32 %v139_v6, 7 }
  0x12   :  { %1317 = vrcp.f32 %v75_v4  ;;  %v1510_v16 = vld [vmem:[#allocation2 + $0x38] sm:$0xff]  ;;  %v303_v17 = vunpack.c.0.s8 %v302_v10  ;;  %v764_v18 = vand.u32 127, %v139_v6  ;;  %v1512_v19 = vld [vmem:[#allocation2 + $0x40] sm:$0xff]  ;;  %v80_v20 = vrot.slane %v1505_v12, 3  ;;  %v1515_v21 = vld [vmem:[#allocation2 + $0x48] sm:$0xff]  ;;  %s1459_s0 = smov [#allocation5]  }
  0x13   :  { %1319 = vrcp.f32 %v76_v5  ;;  %v81_v22 = vrot.slane %v1507_v13, 3  ;;  %v1518_v23 = vld [vmem:[#allocation2 + $0x60] sm:$0xff]  ;;  %v82_v24 = vrot.slane %v1510_v16, 3  ;;  %v1521_v25 = vsub.s32 0, %v140_v15  ;;  %v1523_v26 = vld [vmem:[#allocation2 + $0x68] sm:$0xff]  ;;  %v1531_v31 = vld [vmem:[#allocation2 + $0x70] sm:$0xff] }
  0x14   :  { %1321 = vrcp.f32 %v77_v8  ;;  %v83_v28 = vrot.slane %v1512_v19, 3  ;;  %v1527_v29 = vsub.s32 %v303_v17, %v140_v15  ;;  %v1529_v30 = vadd.s32 1920, %v764_v18  ;;  %v1536_v35 = vld [vmem:[#allocation2 + $0x78] sm:$0xff]  ;;  %v1544_v39 = vld [vmem:[#allocation2 + $0x50] sm:$0xff]  ;;  %s1251_s20 = sshll.u32 %s1459_s0, 4  ;;  %s1252_s20 = int_to_ptr.vmem [resolvable:$true] %s1251_s20 }
  0x15   :  { %1323 = vrcp.f32 %v78_v11  ;;  %v44_v32 = vsub.f32 0.0, %v1493_v1  ;;  %v45_v33 = vsub.f32 0.0, %v1495_v2  ;;  %v84_v34 = vrot.slane %v1515_v21, 3  ;;  %v1555_v46 = vld [vmem:[#allocation2 + $0x58] sm:$0xff]  ;;  %s1369_s21 = scalar_lea.vmem %s1252_s20, 512  ;;  %p1374_p6 = scmp.lt.s32.totalorder %s1252_s20, %s1252_s20 }
  0x16   :  { %1325 = vrcp.f32 %v79_v14  ;;  %1950 = vst [vmem:[#allocation15_spill] sm:$0xff] %v1527_v29  ;;  %v46_v36 = vsub.f32 0.0, %v1497_v3  ;;  %v87_v37 = vrot.slane %v1518_v23, 3  ;;  %v1542_v38 = vmul.f32 %v1491_v0, %v1491_v0  ;;  %p1370_p5 = scmp.ne.s32.totalorder %s1252_s20, %s1369_s21  ;;  %p1375_p7 = scmp.lt.s32.totalorder %s1369_s21, %s1369_s21 }
  0x17   :  { %1327 = vrcp.f32 %v80_v20  ;;  %v47_v40 = vsub.f32 0.0, %v1501_v7  ;;  %v48_v41 = vsub.f32 0.0, %v1505_v12  ;;  %v88_v42 = vrot.slane %v1523_v26, 3 }
  0x18   :  { %1329 = vrcp.f32 %v81_v22  ;;  %v49_v43 = vsub.f32 0.0, %v1507_v13  ;;  %v89_v44 = vrot.slane %v1531_v31, 3  ;;  %v1553_v45 = vmul.f32 %v1493_v1, %v1493_v1  ;;  %p1376_p8 = por %p1375_p7, %p1374_p6 }
  0x19   :  { %1331 = vrcp.f32 %v82_v24  ;;  %v50_v47 = vsub.f32 0.0, %v1510_v16  ;;  %v51_v48 = vsub.f32 0.0, %v1512_v19  ;;  %v90_v49 = vrot.slane %v1536_v35, 3 }
  0x1a   :  { %1333 = vrcp.f32 %v83_v28  ;;  %v85_v51 = vrot.slane %v1544_v39, 3  ;;  %v1564_v52 = vmul.f32 %v1495_v2, %v1495_v2  ;;  %vm989_vm0 = vcmask 1041408   ;;  %p1377_p9 = pnand %p1376_p8, %p1370_p5 }
  0x1b   :  { %1335 = vrcp.f32 %v84_v34  ;;  %v1036_v56 = vmul.f32 %v1497_v3, %v1497_v3  ;;  %v55_v58 = vsub.f32 0.0, %v1518_v23  ;;  %v86_v59 = vrot.slane %v1555_v46, 3 }
  0x1c   :  { %1337 = vrcp.f32 %v87_v37  ;;  %v56_v62 = vsub.f32 0.0, %v1523_v26  ;;  %v57_v63 = vsub.f32 0.0, %v1531_v31  ;;  %v58_v6 = vsub.f32 0.0, %v1536_v35 }
  0x1d   :  { %1339 = vrcp.f32 %v88_v42  ;;  %v1577_v8 = vmul.f32 %v1501_v7, %v1501_v7  ;;  %v1581_v9 = vmul.f32 %v1505_v12, %v1505_v12  ;;  %v1585_v11 = vmul.f32 %v1507_v13, %v1507_v13 }
  0x1e   :  { %1341 = vrcp.f32 %v89_v44  ;;  %v1589_v14 = vmul.f32 %v1510_v16, %v1510_v16  ;;  %v1593_v15 = vmul.f32 %v1512_v19, %v1512_v19  ;;  %v1598_v20 = vmul.f32 %v1515_v21, %v1515_v21 }
  0x1f   :  { %v1318_v53 = vpop.eup %1317  ;;  %1343 = vrcp.f32 %v90_v49  ;;  %v1065_v22 = vrot.slane %v1542_v38, 6  ;;  %v1604_v28 = vmul.f32 %v1544_v39, %v1544_v39  ;;  %v1609_v34 = vmul.f32 %v1555_v46, %v1555_v46 }
  0x20   :  { %v1320_v57 = vpop.eup %1319  ;;  %v108_v60 = vmul.f32 %v1318_v53, %v43_v27  ;;  %1345 = vrcp.f32 %v85_v51  ;;  %v1613_v37 = vmul.f32 %v1518_v23, %v1518_v23  ;;  %v1067_v38 = vrot.slane %v1564_v52, 6 }
  0x21   :  { %v1322_v61 = vpop.eup %1321  ;;  %v110_v4 = vmul.f32 %v1320_v57, %v44_v32  ;;  %1347 = vrcp.f32 %v86_v59  ;;  %v1066_v32 = vrot.slane %v1553_v45, 6  ;;  %v1068_v45 = vrot.slane %v1036_v56, 6 }
  0x22   :  { %v1324_v5 = vpop.eup %1323  ;;  %v112_v10 = vmul.f32 %v1322_v61, %v45_v33  ;;  %v142_v18 = vrot.slane %v108_v60, %v1521_v25  ;;  %v1097_v61 = vsel %vm989_vm0, %v1065_v22, 0.0  ;;  %vm812_vm1 = vcmp.lt.s32.totalorder %v1529_v30, 2000 }
  0x23   :  { %v1326_v17 = vpop.eup %1325  ;;  %v114_v24 = vmul.f32 %v1324_v5, %v46_v36  ;;  %v146_v27 = vrot.slane %v110_v4, %v1521_v25  ;;  %v1617_v36 = vmul.f32 %v1523_v26, %v1523_v26  ;;  %v1098_v56 = vsel %vm989_vm0, %v1066_v32, 0.0 }
  0x24   :  { %v1328_v33 = vpop.eup %1327  ;;  %v116_v44 = vmul.f32 %v1326_v17, %v47_v40  ;;  %v150_v49 = vrot.slane %v112_v10, %v1521_v25  ;;  %v203_v57 = vmul.f32 %v142_v18, %v1491_v0  ;;  %v1099_v18 = vadd.f32 %v1098_v56, %v1097_v61 }
  0x25   :  { %v1330_v42 = vpop.eup %1329  ;;  %v118_v52 = vmul.f32 %v1328_v33, %v48_v41  ;;  %v154_v40 = vrot.slane %v114_v24, %v1521_v25  ;;  %v204_v5 = vmul.f32 %v146_v27, %v1493_v1  ;;  %v1100_v24 = vsel %vm989_vm0, %v1067_v38, 0.0 }
  0x26   :  { %v1332_v53 = vpop.eup %1331  ;;  %v120_v17 = vmul.f32 %v1330_v42, %v49_v43  ;;  %v158_v51 = vrot.slane %v116_v44, %v1521_v25  ;;  %v205_v41 = vmul.f32 %v150_v49, %v1495_v2  ;;  %v1640_v27 = vsel %vm989_vm0, %v1068_v45, 0.0 }
  0x27   :  { %v1334_v4 = vpop.eup %1333  ;;  %v122_v43 = vmul.f32 %v1332_v53, %v50_v47  ;;  %v235_v42 = vrot.slane %v203_v57, 3  ;;  %v162_v22 = vrot.slane %v118_v52, %v1521_v25  ;;  %v206_v44 = vmul.f32 %v154_v40, %v1497_v3 }
  0x28   :  { %v1336_v10 = vpop.eup %1335  ;;  %v236_v54 = vrot.slane %v204_v5, 3  ;;  %v124_v38 = vmul.f32 %v1334_v4, %v51_v48  ;;  %v166_v50 = vrot.slane %v120_v17, %v1521_v25  ;;  %v207_v57 = vmul.f32 %v158_v51, %v1501_v7 }
  0x29   :  { %v1338_v59 = vpop.eup %1337  ;;  %v1951_v61 = vsub.f32 0.0, %v1515_v21  ;;  %v170_v48 = vrot.slane %v122_v43, %v1521_v25  ;;  %v208_v5 = vmul.f32 %v162_v22, %v1505_v12  ;;  %v1952_v51 = vsub.f32 0.0, %v1544_v39 }
  0x2a   :  { %v1340_v32 = vpop.eup %1339  ;;  %v132_v33 = vmul.f32 %v1338_v59, %v55_v58  ;;  %v237_v59 = vrot.slane %v205_v41, 3  ;;  %v174_v17 = vrot.slane %v124_v38, %v1521_v25  ;;  %v1078_v30 = vrot.slane %v1617_v36, 6 }
  0x2b   :  { %v1342_v60 = vpop.eup %1341  ;;  %v134_v55 = vmul.f32 %v1340_v32, %v56_v62  ;;  %v126_v52 = vmul.f32 %v1336_v10, %v1951_v61  ;;  %v209_v32 = vmul.f32 %v166_v50, %v1507_v13  ;;  %v210_v38 = vmul.f32 %v170_v48, %v1510_v16 }
  0x2c   :  { %v1344_v49 = vpop.eup %1343  ;;  %v136_v45 = vmul.f32 %v1342_v60, %v57_v63  ;;  %v190_v47 = vrot.slane %v132_v33, %v1521_v25  ;;  %v239_v33 = vrot.slane %v207_v57, 3  ;;  %v1681_v50 = vadd.f32 %v237_v59, %v1495_v2 }
  0x2d   :  { %v1346_v58 = vpop.eup %1345  ;;  %v138_v62 = vmul.f32 %v1344_v49, %v58_v6  ;;  %v194_v53 = vrot.slane %v134_v55, %v1521_v25  ;;  %v238_v55 = vrot.slane %v206_v44, 3  ;;  %v240_v61 = vrot.slane %v208_v5, 3 }
  0x2e   :  { %v198_v63 = vrot.slane %v136_v45, %v1521_v25  ;;  %v215_v60 = vmul.f32 %v190_v47, %v1518_v23  ;;  %v1348_v4 = vpop.eup %1347  ;;  %v128_v56 = vmul.f32 %v1346_v58, %v1952_v51  ;;  %v1953_v45 = vsub.f32 0.0, %v1555_v46  ;;  %1954 = vst [vmem:[#allocation16_spill] sm:$0xff] %v1681_v50 }
  0x2f   :  { %v202_v40 = vrot.slane %v138_v62, %v1521_v25  ;;  %v216_v6 = vmul.f32 %v194_v53, %v1523_v26  ;;  %v178_v47 = vrot.slane %v126_v52, %v1521_v25  ;;  %v1674_v62 = vadd.f32 %v235_v42, %v1491_v0 }
  0x30   :  { %v217_v10 = vmul.f32 %v198_v63, %v1531_v31  ;;  %v247_v41 = vrot.slane %v215_v60, 3  ;;  %v130_v22 = vmul.f32 %v1348_v4, %v1953_v45  ;;  %v1678_v53 = vadd.f32 %v236_v54, %v1493_v1 }
  0x31   :  { %v218_v43 = vmul.f32 %v202_v40, %v1536_v35  ;;  %v248_v49 = vrot.slane %v216_v6, 3  ;;  %v182_v57 = vrot.slane %v128_v56, %v1521_v25  ;;  %v211_v42 = vmul.f32 %v174_v17, %v1512_v19 }
  0x32   :  { %v249_v44 = vrot.slane %v217_v10, 3  ;;  %v1685_v63 = vadd.f32 %v247_v41, %v1518_v23  ;;  %v1692_v48 = vadd.f32 %v238_v55, %v1497_v3  ;;  %v241_v60 = vrot.slane %v209_v32, 3 }
  0x33   :  { %v250_v58 = vrot.slane %v218_v43, 3  ;;  %v1688_v52 = vadd.f32 %v248_v49, %v1523_v26  ;;  %v1701_v4 = vadd.f32 %v239_v33, %v1501_v7  ;;  %v1139_v5 = vmul.f32 %v1674_v62, %v1674_v62 }
  0x34   :  { %1955 = vst [vmem:[#allocation17_spill] sm:$0xff] %v1692_v48  ;;  %v1695_v54 = vadd.f32 %v249_v44, %v1531_v31  ;;  %v1140_v55 = vmul.f32 %v1678_v53, %v1678_v53  ;;  %v1141_v51 = vmul.f32 %v1681_v50, %v1681_v50  ;;  %v1101_v56 = vadd.f32 %v1100_v24, %v1099_v18 }
  0x35   :  { %v1698_v59 = vadd.f32 %v250_v58, %v1536_v35  ;;  %1956 = vst [vmem:[#allocation18_spill] sm:$0xff] %v1701_v4  ;;  %v353_v40 = vcombine.low %v1685_v63, %v1688_v52  ;;  %v186_v17 = vrot.slane %v130_v22, %v1521_v25  ;;  %v212_v10 = vmul.f32 %v178_v47, %v1515_v21 }
  0x36   :  { %v242_v41 = vrot.slane %v210_v38, 3  ;;  %v213_v43 = vmul.f32 %v182_v57, %v1544_v39  ;;  %v1720_v33 = vadd.f32 %v240_v61, %v1505_v12  ;;  %v1142_v45 = vmul.f32 %v1692_v48, %v1692_v48 }
  0x37   :  { %v354_v6 = vcombine.low %v1695_v54, %v1698_v59  ;;  %v1716_v32 = vrot.slane %v353_v40, %v1527_v29  ;;  %v243_v18 = vrot.slane %v211_v42, 3  ;;  %v1728_v25 = vadd.f32 %v241_v60, %v1507_v13 }
  0x38   :  { %1958 = vst [vmem:[#allocation20_spill] sm:$0xff] %v1720_v33  ;;  %v1143_v24 = vmul.f32 %v1701_v4, %v1701_v4  ;;  %v1171_v22 = vrot.slane %v1139_v5, 1  ;;  %v1172_v38 = vrot.slane %v1140_v55, 1  ;;  %v1173_v58 = vrot.slane %v1141_v51, 1 }
  0x39   :  { %1957 = vst [vmem:[#allocation19_spill] sm:$0xff] %v1716_v32  ;;  %v1723_v49 = vrot.slane %v354_v6, %v1527_v29  ;;  %1960 = vst [vmem:[#allocation22_spill] sm:$0xff] %v1728_v25  ;;  %v214_v57 = vmul.f32 %v186_v17, %v1555_v46  ;;  %v244_v61 = vrot.slane %v212_v10, 3  ;;  %v1741_v40 = vadd.f32 %v242_v41, %v1510_v16 }
  0x3a   :  { %v1144_v5 = vmul.f32 %v1720_v33, %v1720_v33  ;;  %v1174_v6 = vrot.slane %v1142_v45, 1  ;;  %v1961_v44 = vrot.slane %v1577_v8, 6  ;;  %v245_v55 = vrot.slane %v213_v43, 3 }
  0x3b   :  { %1959 = vst [vmem:[#allocation21_spill] sm:$0xff] %v1723_v49  ;;  %v1749_v51 = vadd.f32 %v243_v18, %v1512_v19  ;;  %v1145_v17 = vmul.f32 %v1728_v25, %v1728_v25  ;;  %v1103_v10 = vadd.f32 %v1640_v27, %v1101_v56  ;;  %v1175_v60 = vrot.slane %v1143_v24, 1 }
  0x3c   :  { %v1104_v47 = vsel %vm989_vm0, %v1961_v44, 0.0  ;;  %v1203_v41 = vsel %vm989_vm0, %v1171_v22, 0.0  ;;  %v1204_v42 = vsel %vm989_vm0, %v1172_v38, 0.0  ;;  %v1206_v45 = vsel %vm989_vm0, %v1173_v58, 0.0 }
  0x3d   :  { %v246_v49 = vrot.slane %v214_v57, 3  ;;  %v1758_v8 = vadd.f32 %v244_v61, %v1515_v21  ;;  %v1205_v43 = vadd.f32 %v1204_v42, %v1203_v41  ;;  %v1146_v44 = vmul.f32 %v1741_v40, %v1741_v40 }
  0x3e   :  { %v1176_v32 = vrot.slane %v1144_v5, 1  ;;  %v1208_v27 = vsel %vm989_vm0, %v1174_v6, 0.0  ;;  %v1962_v56 = vrot.slane %v1581_v9, 6  ;;  %v1105_v38 = vadd.f32 %v1104_v47, %v1103_v10 }
  0x3f   :  { %v1207_v22 = vadd.f32 %v1206_v45, %v1205_v43  ;;  %v1963_v58 = vrot.slane %v1585_v11, 6  ;;  %v1964_v61 = vrot.slane %v1589_v14, 6  ;;  %v1778_v5 = vadd.f32 %v245_v55, %v1544_v39 }
  0x40   :  { %v1106_v24 = vsel %vm989_vm0, %v1962_v56, 0.0  ;;  %v1147_v9 = vmul.f32 %v1749_v51, %v1749_v51  ;;  %v1177_v6 = vrot.slane %v1145_v17, 1  ;;  %v1210_v41 = vsel %vm989_vm0, %v1175_v60, 0.0 }
  0x41   :  { %v1770_v57 = vsel %vm989_vm0, %v1963_v58, 0.0  ;;  %v1775_v42 = vsel %vm989_vm0, %v1964_v61, 0.0  ;;  %v1784_v47 = vadd.f32 %v246_v49, %v1555_v46  ;;  %v1148_v11 = vmul.f32 %v1758_v8, %v1758_v8 }
  0x42   :  { %v1209_v10 = vadd.f32 %v1208_v27, %v1207_v22  ;;  %v1965_v14 = vrot.slane %v1593_v15, 6  ;;  %v1178_v55 = vrot.slane %v1146_v44, 1  ;;  %v1212_v43 = vsel %vm989_vm0, %v1176_v32, 0.0 }
  0x43   :  { %v893_v56 = vrot.slane %v1674_v62, 3  ;;  %v894_v17 = vrot.slane %v1678_v53, 3  ;;  %v1799_v49 = vsel %vm812_vm1, %v1698_v59, 0.0  ;;  %v895_v27 = vrot.slane %v1681_v50, 3 }
  0x44   :  { %v1791_v45 = vsel %vm989_vm0, %v1965_v14, 0.0  ;;  %v1211_v60 = vadd.f32 %v1210_v41, %v1209_v10  ;;  %v1802_v22 = vadd.f32 %v1106_v24, %v1105_v38  ;;  %v1149_v15 = vmul.f32 %v1778_v5, %v1778_v5 }
  0x45   :  { %v1179_v44 = vrot.slane %v1147_v9, 1  ;;  %v1214_v32 = vsel %vm989_vm0, %v1177_v6, 0.0  ;;  %v896_v58 = vrot.slane %v1692_v48, 3  ;;  %v1150_v61 = vmul.f32 %v1784_v47, %v1784_v47 }
  0x46   :  { %v1151_v59 = vmul.f32 %v1685_v63, %v1685_v63  ;;  %v1180_v14 = vrot.slane %v1148_v11, 1  ;;  %v1213_v41 = vadd.f32 %v1212_v43, %v1211_v60  ;;  %v1216_v10 = vsel %vm989_vm0, %v1178_v55, 0.0 }
  0x47   :  { %v897_v24 = vrot.slane %v1701_v4, 3  ;;  %v925_v38 = vmul.f32 %v893_v56, %v1491_v0  ;;  %v926_v9 = vmul.f32 %v894_v17, %v1493_v1  ;;  %v1152_v6 = vmul.f32 %v1688_v52, %v1688_v52 }
  0x48   :  { %v1153_v18 = vmul.f32 %v1695_v54, %v1695_v54  ;;  %v1215_v29 = vadd.f32 %v1214_v32, %v1213_v41  ;;  %v927_v50 = vmul.f32 %v895_v27, %v1495_v2  ;;  %v1181_v48 = vrot.slane %v1149_v15, 1 }
  0x49   :  { %v1218_v11 = vsel %vm989_vm0, %v1179_v44, 0.0  ;;  %v898_v55 = vrot.slane %v1720_v33, 3  ;;  %v928_v43 = vmul.f32 %v896_v58, %v1497_v3  ;;  %v1154_v0 = vmul.f32 %v1799_v49, %v1799_v49 }
  0x4a   :  { %v1182_v1 = vrot.slane %v1150_v61, 1  ;;  %v1217_v56 = vadd.f32 %v1216_v10, %v1215_v29  ;;  %v1220_v17 = vsel %vm989_vm0, %v1180_v14, 0.0  ;;  %v899_v60 = vrot.slane %v1728_v25, 3 }
  0x4b   :  { %v929_v32 = vmul.f32 %v897_v24, %v1501_v7  ;;  %v957_v41 = vrot.slane %v925_v38, 6  ;;  %v958_v2 = vrot.slane %v926_v9, 6  ;;  %v1183_v27 = vrot.slane %v1151_v59, 1 }
  0x4c   :  { %v1184_v15 = vrot.slane %v1152_v6, 1  ;;  %v1219_v44 = vadd.f32 %v1218_v11, %v1217_v56  ;;  %v959_v4 = vrot.slane %v927_v50, 6  ;;  %v1222_v33 = vsel %vm989_vm0, %v1181_v48, 0.0 }
  0x4d   :  { %v900_v3 = vrot.slane %v1741_v40, 3  ;;  %v930_v58 = vmul.f32 %v898_v55, %v1505_v12  ;;  %v960_v61 = vrot.slane %v928_v43, 6  ;;  %v1185_v29 = vrot.slane %v1153_v18, 1 }
  0x4e   :  { %v1221_v10 = vadd.f32 %v1220_v17, %v1219_v44  ;;  %v1224_v14 = vsel %vm989_vm0, %v1182_v1, 0.0  ;;  %v901_v25 = vrot.slane %v1749_v51, 3  ;;  %v931_v7 = vmul.f32 %v899_v60, %v1507_v13 }
  0x4f   :  { %v961_v24 = vrot.slane %v929_v32, 6  ;;  %v990_v59 = vsel %vm989_vm0, %v957_v41, 0.0  ;;  %v991_v50 = vsel %vm989_vm0, %v958_v2, 0.0  ;;  %v1226_v48 = vsel %vm989_vm0, %v1183_v27, 0.0 }
  0x50   :  { %v1223_v38 = vadd.f32 %v1222_v33, %v1221_v10  ;;  %v992_v9 = vadd.f32 %v991_v50, %v990_v59  ;;  %v993_v12 = vsel %vm989_vm0, %v959_v4, 0.0  ;;  %v902_v18 = vrot.slane %v1758_v8, 3 }
  0x51   :  { %v932_v6 = vmul.f32 %v900_v3, %v1510_v16  ;;  %v962_v11 = vrot.slane %v930_v58, 6  ;;  %v995_v55 = vsel %vm989_vm0, %v960_v61, 0.0  ;;  %v1186_v43 = vrot.slane %v1154_v0, 1 }
  0x52   :  { %v1225_v13 = vadd.f32 %v1224_v14, %v1223_v38  ;;  %v1228_v1 = vsel %vm989_vm0, %v1184_v15, 0.0  ;;  %v994_v56 = vadd.f32 %v993_v12, %v992_v9  ;;  %v903_v17 = vrot.slane %v1778_v5, 3 }
  0x53   :  { %v933_v33 = vmul.f32 %v901_v25, %v1512_v19  ;;  %v963_v60 = vrot.slane %v931_v7, 6  ;;  %v997_v32 = vsel %vm989_vm0, %v961_v24, 0.0  ;;  %v1230_v41 = vsel %vm989_vm0, %v1185_v29, 0.0 }
  0x54   :  { %v1227_v4 = vadd.f32 %v1226_v48, %v1225_v13  ;;  %v904_v16 = vrot.slane %v1784_v47, 3  ;;  %v996_v2 = vadd.f32 %v995_v55, %v994_v56  ;;  %v934_v27 = vmul.f32 %v902_v18, %v1515_v21 }
  0x55   :  { %v964_v0 = vrot.slane %v932_v6, 6  ;;  %v999_v44 = vsel %vm989_vm0, %v962_v11, 0.0  ;;  %v1109_v15 = vadd.f32 %v1770_v57, %v1802_v22  ;;  %v1232_v19 = vsel %vm989_vm0, %v1186_v43, 0.0 }
  0x56   :  { %v1229_v3 = vadd.f32 %v1228_v1, %v1227_v4  ;;  %v905_v25 = vrot.slane %v1685_v63, 3  ;;  %v998_v58 = vadd.f32 %v997_v32, %v996_v2  ;;  %v935_v61 = vmul.f32 %v903_v17, %v1544_v39 }
  0x57   :  { %v965_v29 = vrot.slane %v933_v33, 6  ;;  %v1001_v10 = vsel %vm989_vm0, %v963_v60, 0.0  ;;  %v1111_v14 = vadd.f32 %v1775_v42, %v1109_v15  ;;  %v906_v7 = vrot.slane %v1688_v52, 3 }
  0x58   :  { %v1231_v21 = vadd.f32 %v1230_v41, %v1229_v3  ;;  %v1000_v24 = vadd.f32 %v999_v44, %v998_v58  ;;  %v1966_v59 = vrot.slane %v1598_v20, 6  ;;  %v936_v22 = vmul.f32 %v904_v16, %v1555_v46 }
  0x59   :  { %v966_v50 = vrot.slane %v934_v27, 6  ;;  %v1003_v63 = vsel %vm989_vm0, %v964_v0, 0.0  ;;  %v1113_v39 = vadd.f32 %v1791_v45, %v1111_v14  ;;  %v907_v48 = vrot.slane %v1695_v54, 3 }
  0x5a   :  { %v1114_v57 = vsel %vm989_vm0, %v1966_v59, 0.0  ;;  %v1233_v38 = vadd.f32 %v1232_v19, %v1231_v21  ;;  %v1002_v9 = vadd.f32 %v1001_v10, %v1000_v24  ;;  %v1967_v42 = vrot.slane %v1604_v28, 6 }
  0x5b   :  { %v937_v12 = vmul.f32 %v905_v25, %v1518_v23  ;;  %v967_v20 = vrot.slane %v935_v61, 6  ;;  %v1005_v18 = vsel %vm989_vm0, %v965_v29, 0.0  ;;  %v1115_v6 = vadd.f32 %v1114_v57, %v1113_v39 }
  0x5c   :  { %v1116_v52 = vsel %vm989_vm0, %v1967_v42, 0.0  ;;  %1234 = vadd.xlane.f32.xlu1 %v1233_v38  ;;  %v860_v46 = vsel %vm812_vm1, %v1536_v35, 0.0  ;;  %v908_v45 = vrot.slane %v1799_v49, 3  ;;  %v1004_v11 = vadd.f32 %v1003_v63, %v1002_v9  ;;  %v1971_v63 = vld [vmem:[#allocation16_spill] sm:$0xff]  ;;  %v1974_v42 = vld [vmem:[#allocation22_spill] sm:$0xff] }
  0x5d   :  { %v1968_v54 = vrot.slane %v1609_v34, 6  ;;  %v938_v55 = vmul.f32 %v906_v7, %v1523_v26  ;;  %v968_v43 = vrot.slane %v936_v22, 6  ;;  %v1007_v23 = vsel %vm989_vm0, %v966_v50, 0.0  ;;  %v1970_v50 = vld [vmem:[#allocation17_spill] sm:$0xff]  ;;  %v1972_v38 = vld [vmem:[#allocation20_spill] sm:$0xff] }
  0x5e   :  { %v1117_v13 = vadd.f32 %v1116_v52, %v1115_v6  ;;  %v1006_v1 = vadd.f32 %v1005_v18, %v1004_v11  ;;  %v1047_v56 = vmul.f32 %v1531_v31, %v1531_v31  ;;  %v1969_v35 = vrot.slane %v1613_v37, 6  ;;  %v1975_v18 = vld [vmem:[#allocation15_spill] sm:$0xff]  ;;  %v1977_v11 = vld [vmem:[#allocation21_spill] sm:$0xff] }
  0x5f   :  { %v1118_v28 = vsel %vm989_vm0, %v1968_v54, 0.0  ;;  %v939_v34 = vmul.f32 %v907_v48, %v1531_v31  ;;  %v969_v17 = vrot.slane %v937_v12, 6  ;;  %v1009_v33 = vsel %vm989_vm0, %v967_v20, 0.0  ;;  %v1973_v48 = vld [vmem:[#allocation18_spill] sm:$0xff] }
  0x60   :  { %v1120_v49 = vsel %vm989_vm0, %v1969_v35, 0.0  ;;  %v1119_v26 = vadd.f32 %v1118_v28, %v1117_v13  ;;  %v1008_v60 = vadd.f32 %v1007_v23, %v1006_v1  ;;  %v940_v32 = vmul.f32 %v908_v45, %v860_v46  ;;  %v1976_v45 = vld [vmem:[#allocation19_spill] sm:$0xff] }
  0x61   :  { %v970_v4 = vrot.slane %v938_v55, 6  ;;  %v1011_v41 = vsel %vm989_vm0, %v968_v43, 0.0  ;;  %v1048_v2 = vmul.f32 %v860_v46, %v860_v46  ;;  %v971_v0 = vrot.slane %v939_v34, 6 }
  0x62   :  { %v1010_v16 = vadd.f32 %v1009_v33, %v1008_v60  ;;  %v1121_v27 = vadd.f32 %v1120_v49, %v1119_v26  ;;  %v1013_v36 = vsel %vm989_vm0, %v969_v17, 0.0  ;;  %v1079_v37 = vrot.slane %v1047_v56, 6 }
  0x63   :  { %v1122_v44 = vsel %vm989_vm0, %v1078_v30, 0.0  ;;  %v972_v31 = vrot.slane %v940_v32, 6  ;;  %v1015_v3 = vsel %vm989_vm0, %v970_v4, 0.0  ;;  %v1017_v58 = vsel %vm989_vm0, %v971_v0, 0.0 }
  0x64   :  { %v1012_v15 = vadd.f32 %v1011_v41, %v1010_v16  ;;  %v1123_v25 = vadd.f32 %v1122_v44, %v1121_v27  ;;  %v1080_v61 = vrot.slane %v1048_v2, 6  ;;  %v1124_v29 = vsel %vm989_vm0, %v1079_v37, 0.0 }
  0x65   :  { %v1019_v14 = vsel %vm989_vm0, %v972_v31, 0.0  ;;  %v299_v22 = vcombine.low %v1674_v62, %v1678_v53  ;;  %v300_v39 = vcombine.low %v1971_v63, %v1970_v50  ;;  %v317_v9 = vcombine.low %v1973_v48, %v1972_v38 }
  0x66   :  { %v1014_v19 = vadd.f32 %v1013_v36, %v1012_v15  ;;  %v1125_v7 = vadd.f32 %v1124_v29, %v1123_v25  ;;  %v1126_v24 = vsel %vm989_vm0, %v1080_v61, 0.0  ;;  %v318_v52 = vcombine.low %v1974_v42, %v1741_v40 }
  0x67   :  { %v335_v12 = vcombine.low %v1749_v51, %v1758_v8  ;;  %v336_v20 = vcombine.low %v1778_v5, %v1784_v47  ;;  %v307_v6 = vrot.slane %v299_v22, %v1975_v18  ;;  %v314_v46 = vrot.slane %v300_v39, %v1975_v18 }
  0x68   :  { %v1016_v10 = vadd.f32 %v1015_v3, %v1014_v19  ;;  %v1127_v57 = vadd.f32 %v1126_v24, %v1125_v7  ;;  %v325_v62 = vrot.slane %v317_v9, %v1975_v18  ;;  %v332_v53 = vrot.slane %v318_v52, %v1975_v18 }
  0x69   :  { %v1978_v54 = vcombine.low %v1976_v45, %v1977_v11  ;;  %v1979_v40 = vcombine.high %v1976_v45, %v1977_v11  ;;  %v343_v51 = vrot.slane %v335_v12, %v1975_v18  ;;  %v350_v8 = vrot.slane %v336_v20, %v1975_v18 }
  0x6a   :  { %v1018_v21 = vadd.f32 %v1017_v58, %v1016_v10  ;;  %v315_v5 = vcombine.low %v307_v6, %v314_v46  ;;  %v316_v47 = vcombine.high %v307_v6, %v314_v46  ;;  %v333_v43 = vcombine.low %v325_v62, %v332_v53 }
  0x6b   :  { %v1304_v28 = vrot.slane %v1978_v54, 9  ;;  %v392_v55 = vrot.slane %v1979_v40, 7  ;;  %v334_v23 = vcombine.high %v325_v62, %v332_v53  ;;  %v351_v13 = vcombine.low %v343_v51, %v350_v8 }
  0x6c   :  { %v1020_v59 = vadd.f32 %v1019_v14, %v1018_v21  ;;  %v352_v1 = vcombine.high %v343_v51, %v350_v8  ;;  %vm371_vm2 = vcmask 1040384   ;;  %vm372_vm3 = vcmask 1042434  }
  0x6d   :  { %vm373_vm4 = vmor %vm371_vm2, %vm372_vm3  ;;  %vm374_vm5 = vcmask 1044484   ;;  %vm376_vm6 = vcmask 1046534   ;;  %v1301_v56 = vrot.slane %v315_v5, 9  ;;  %v380_v30 = vrot.slane %v316_v47, 7 }
  0x6e   :  { %1021 = vadd.xlane.f32.xlu0 %v1020_v59  ;;  %vm375_vm7 = vmor %vm373_vm4, %vm374_vm5  ;;  %v1302_v35 = vrot.slane %v333_v43, 9  ;;  %v384_v49 = vrot.slane %v334_v23, 7  ;;  %v1303_v34 = vrot.slane %v351_v13, 9  ;;  %v388_v17 = vrot.slane %v352_v1, 7 }
  0x6f   :  { %vm377_vm8 = vmor %vm375_vm7, %vm376_vm6 }
  0x70   :  { %v381_v33 = vsel %vm377_vm8, %v1301_v56, %v380_v30  ;;  %v385_v26 = vsel %vm377_vm8, %v1302_v35, %v384_v49  ;;  %v389_v60 = vsel %vm377_vm8, %v1303_v34, %v388_v17  ;;  %v393_v32 = vsel %vm377_vm8, %v1304_v28, %v392_v55 }
  0x71   :  { %398 = vst [vmem:[#allocation5] sm:$0xff] %v381_v33  ;;  %399 = vst [vmem:[#allocation5 + $0x8] sm:$0xff] %v385_v26 }
  0x72   :  { %1128 = vadd.xlane.f32.xlu0 %v1127_v57  ;;  %400 = vst [vmem:[#allocation5 + $0x10] sm:$0xff] %v389_v60  ;;  %401 = vst [vmem:[#allocation5 + $0x18] sm:$0xff] %v393_v32 }
  0x73   :  { %1380 = shalt.err (!%p1377_p9)
}
  0x74   :  { %1254 = dma.vmem_to_hbm [thread:$0]  %s1252_s20, 512, %s1935_s1, [#allocation4]   ;;  %vm1031_vm9 = vcmask 0  }
  0x75   :  { %s1460_s1 = smov [#allocation6]   ;;  %s1461_s26 = smov [#allocation8]  }
  0x76   :  { %s1261_s24 = sshll.u32 %s1460_s1, 4  ;;  %s1271_s27 = sshll.u32 %s1461_s26, 4  ;;  %s1262_s24 = int_to_ptr.vmem [resolvable:$true] %s1261_s24  ;;  %s1272_s27 = int_to_ptr.vmem [resolvable:$true] %s1271_s27 }
  0x77   :  { %s1462_s28 = smov [#allocation9]   ;;  %s1389_s30 = scalar_lea.vmem %s1262_s24, 16 }
  0x78   :  { %s1281_s29 = sshll.u32 %s1462_s28, 4  ;;  %p1390_p10 = scmp.ne.s32.totalorder %s1262_s24, %s1389_s30  ;;  %s1282_s29 = int_to_ptr.vmem [resolvable:$true] %s1281_s29 }
  0x79   :  { %s1393_s5 = scalar_lea.vmem %s1262_s24, 32  ;;  %p1394_p11 = scmp.lt.s32.totalorder %s1262_s24, %s1262_s24 }
  0x7a   :  { %p1395_p12 = scmp.lt.s32.totalorder %s1393_s5, %s1389_s30 }
  0x7c   :  { %p1396_p13 = por %p1395_p12, %p1394_p11 }
  0x7e   :  { %p1397_p0 = pnand %p1396_p13, %p1390_p10 }
  0xe5   :  { %v1235_v4 = vpop.xlane.xlu1 %1234 }
  0xe6   :  { %v1236_v41 = vrot.slane %v1235_v4, 4 }
  0xe8   :  { %v1237_v16 = vadd.f32 %v1236_v41, %v1235_v4 }
  0xea   :  { %v1238_v36 = vrot.slane %v1237_v16, 2 }
  0xec   :  { %v1239_v19 = vadd.f32 %v1238_v36, %v1237_v16 }
  0xee   :  { %v1240_v10 = vrot.slane %v1239_v19, 1 }
  0xf0   :  { %v1241_v7 = vadd.f32 %v1240_v10, %v1239_v19 }
  0xf7   :  { %v1022_v2 = vpop.xlane.xlu0 %1021 }
  0xf8   :  { %v1023_v27 = vrot.slane %v1022_v2, 4 }
  0xfa   :  { %v1024_v0 = vadd.f32 %v1023_v27, %v1022_v2 }
  0xfb   :  { %v1129_v37 = vpop.xlane.xlu0 %1128 }
  0xfc   :  { %v1025_v44 = vrot.slane %v1024_v0, 2  ;;  %v1130_v15 = vrot.slane %v1129_v37, 4 }
  0xfe   :  { %v1131_v31 = vadd.f32 %v1130_v15, %v1129_v37  ;;  %v1026_v3 = vadd.f32 %v1025_v44, %v1024_v0 }
 0x100   :  { %v1132_v25 = vrot.slane %v1131_v31, 2  ;;  %v1027_v58 = vrot.slane %v1026_v3, 1 }
 0x102   :  { %v1133_v61 = vadd.f32 %v1132_v25, %v1131_v31  ;;  %v1028_v29 = vadd.f32 %v1027_v58, %v1026_v3 }
 0x104   :  { %1305 = vpush %v1028_v29  ;;  %v1134_v14 = vrot.slane %v1133_v61, 1 }
 0x106   :  { %v1135_v21 = vadd.f32 %v1134_v14, %v1133_v61 }
 0x108   :  { %1307 = vpush %v1135_v21 }
 0x109   :  { %1309 = vpush %v1241_v7 }
 0x135   :  { %s1306_s25 = spop %1305 }
 0x136   :  { %v1030_v24 = vstv %s1306_s25 }
 0x137   :  { %1032 = vst.msk [vmem:[#allocation6] sm:$0x1] %vm1031_vm9, %v1030_v24 }
 0x138   :  { %1400 = shalt.err (!%p1397_p0)
}
 0x139   :  { %1264 = dma.vmem_to_hbm [thread:$0]  %s1262_s24, 16, %s1936_s2, [#allocation7]  }
 0x13a   :  { %s1308_s8 = spop %1307  ;;  %s1409_s10 = scalar_lea.vmem %s1272_s27, 16 }
 0x13b   :  { %v1137_v59 = vstv %s1308_s8  ;;  %s1310_s9 = spop %1309  ;;  %p1410_p1 = scmp.ne.s32.totalorder %s1272_s27, %s1409_s10 }
 0x13c   :  { %1138 = vst.msk [vmem:[#allocation8] sm:$0x1] %vm1031_vm9, %v1137_v59  ;;  %v1243_v57 = vstv %s1310_s9  ;;  %s1413_s11 = scalar_lea.vmem %s1272_s27, 32  ;;  %p1414_p2 = scmp.lt.s32.totalorder %s1272_s27, %s1272_s27 }
 0x13d   :  { %1244 = vst.msk [vmem:[#allocation9] sm:$0x1] %vm1031_vm9, %v1243_v57  ;;  %p1415_p3 = scmp.lt.s32.totalorder %s1413_s11, %s1409_s10 }
 0x13f   :  { %p1416_p4 = por %p1415_p3, %p1414_p2 }
 0x141   :  { %p1417_p5 = pnand %p1416_p4, %p1410_p1 }
 0x143   :  { %1420 = shalt.err (!%p1417_p5)
}
 0x144   :  { %1274 = dma.vmem_to_hbm [thread:$0]  %s1272_s27, 16, %s1937_s3, [#allocation7]  }
 0x145   :  { %s1429_s13 = scalar_lea.vmem %s1282_s29, 16  ;;  %s1433_s14 = scalar_lea.vmem %s1282_s29, 32 }
 0x146   :  { %p1430_p6 = scmp.ne.s32.totalorder %s1282_s29, %s1429_s13  ;;  %p1434_p7 = scmp.lt.s32.totalorder %s1282_s29, %s1282_s29 }
 0x147   :  { %p1435_p8 = scmp.lt.s32.totalorder %s1433_s14, %s1429_s13 }
 0x149   :  { %p1436_p9 = por %p1435_p8, %p1434_p7 }
 0x14b   :  { %p1437_p10 = pnand %p1436_p9, %p1430_p6 }
 0x14d   :  { %1440 = shalt.err (!%p1437_p10)
}
 0x14e   :  { %1284 = dma.vmem_to_hbm [thread:$0]  %s1282_s29, 16, %s1938_s4, [#allocation10]  }
 0x14f   :  { %1451 = dma.done.wait [#allocation4], 512  }
 0x150   :  { %1452 = vsyncadd [#allocation4], 4294966784 }
 0x151   :  { %1453 = dma.done.wait [#allocation7], 32  }
 0x152   :  { %1454 = vsyncadd [#allocation7], 4294967264 }
 0x153   :  { %1455 = dma.done.wait [#allocation10], 16  }
 0x154   :  { %1456 = vsyncadd [#allocation10], 4294967280 }
 0x155   :  { %1297 = vsyncpa [#allocation3], 1 }
 0x156   :  { %1298 = vsyncpa [#allocation4], 1 }
 0x157   :  { %1299 = vsyncpa [#allocation7], 1 }
 0x158   :  { %1300 = vsyncpa [#allocation10], 1 }

</bundles_post_ra>
